<compile_context>
chip_gen: v6e
topology: v6e:2x2x1
jax: 0.10.0
libtpu: 0.0.40
codegen_flags: <defaults>
</compile_context>

<pallas_src>
import functools

import jax
import jax.numpy as jnp
from jax import lax
from jax.experimental import pallas as pl
from jax.experimental.pallas import tpu as pltpu


# ----------------------------------------------------------------------------
# generation-aware sizing helpers
# ----------------------------------------------------------------------------
def _hw_params():
    """Per-generation VMEM limit, streaming x-tile budget, fused-path budget."""
    kind = ""
    try:
        kind = jax.devices()[0].device_kind.lower()
    except Exception:
        pass
    if "v7" in kind:  # 64 MiB physical VMEM per TC -> leave headroom
        return dict(vmem_limit=48 << 20, tile_budget=6 << 20, fuse_limit=20 << 20)
    # v5e / v6e: 128 MiB physical VMEM
    return dict(vmem_limit=64 << 20, tile_budget=8 << 20, fuse_limit=32 << 20)


def _row_tile(n_rows, n_cols, itemsize, tile_budget_bytes):
    """Rows/tile: multiple of the dtype sublane packing; x-tile <= budget."""
    pack = max(8, 32 // max(1, itemsize))          # 8 f32, 16 bf16, 32 int8
    fit = (tile_budget_bytes // max(1, n_cols * itemsize)) // pack * pack
    fit = max(pack, fit)
    rows_padded = -(-n_rows // pack) * pack
    return max(pack, min(fit, rows_padded))


# ----------------------------------------------------------------------------
# graphnorm
#   mean_g = sum_{i in g} x_i / n_g
#   sub_i  = x_i - mean_g * mean_scale
#   std_g  = sqrt(sum_{i in g} sub_i^2 / n_g + 1e-6)
#   out_i  = weight * sub_i / std_g + bias
# ----------------------------------------------------------------------------
def _graphnorm_fused_kernel(x_ref, sc_ref, ec_ref, sr_ref, er_ref, cnt_ref,
                            w_ref, b_ref, ms_ref, o_ref):
    """x fully resident in VMEM: one HBM read, one write, centered variance."""
    n, d = x_ref.shape
    nb = cnt_ref.shape[0]
    x = x_ref[...].astype(jnp.float32)

    col = lax.broadcasted_iota(jnp.int32, (nb, n), 1)          # (B, N) membership
    oh_t = ((col >= sc_ref[...]) & (col < ec_ref[...])).astype(jnp.float32)
    row = lax.broadcasted_iota(jnp.int32, (n, nb), 0)          # (N, B) membership
    oh = ((row >= sr_ref[...]) & (row < er_ref[...])).astype(jnp.float32)

    inv_cnt = 1.0 / cnt_ref[...]                               # (B, 1)
    mean = jnp.dot(oh_t, x, preferred_element_type=jnp.float32) * inv_cnt
    mu = mean * ms_ref[...]                                    # (B, D)
    sub = x - jnp.dot(oh, mu, preferred_element_type=jnp.float32)
    var = jnp.dot(oh_t, sub * sub, preferred_element_type=jnp.float32) * inv_cnt
    scale = w_ref[...] * lax.rsqrt(var + 1e-6)                 # (B, D) = w / std
    row_scale = jnp.dot(oh, scale, preferred_element_type=jnp.float32)
    o_ref[...] = (sub * row_scale + b_ref[...]).astype(o_ref.dtype)


def _graphnorm_stats_kernel(x_ref, sc_ref, ec_ref, out_ref, *,
                            n_rows, tiles_per_split, mm_dtype):
    c = pl.program_id(0)
    i = pl.program_id(1)
    tm = x_ref.shape[0]
    nb = sc_ref.shape[0]
    row0 = (c * tiles_per_split + i) * tm

    x = x_ref[...].astype(jnp.float32)
    rowc = lax.broadcasted_iota(jnp.int32, (tm, 1), 0) + row0
    x = jnp.where(rowc < n_rows, x, 0.0)                       # mask pad / dup rows

    row_bt = lax.broadcasted_iota(jnp.int32, (nb, tm), 1) + row0
    oh_t = ((row_bt >= sc_ref[...]) & (row_bt < ec_ref[...])).astype(mm_dtype)

    # single MXU push: [sum(x), sum(x^2)] per graph
    xx = jnp.concatenate([x, x * x], axis=-1).astype(mm_dtype)

    @pl.when(i == 0)
    def _():
        out_ref[...] = jnp.zeros_like(out_ref)

    out_ref[...] += jnp.dot(oh_t, xx, preferred_element_type=jnp.float32)


def _graphnorm_apply_kernel(x_ref, ss_ref, sr_ref, er_ref, o_ref, *, mm_dtype):
    i = pl.program_id(0)
    tm, d = o_ref.shape
    nb = ss_ref.shape[0]

    row = lax.broadcasted_iota(jnp.int32, (tm, nb), 0) + i * tm
    oh = ((row >= sr_ref[...]) & (row < er_ref[...])).astype(mm_dtype)
    # single MXU gather of concatenated [scale, shift]  (B, 2D) -> (TM, 2D)
    ss = jnp.dot(oh, ss_ref[...].astype(mm_dtype),
                 preferred_element_type=jnp.float32)
    x = x_ref[...].astype(jnp.float32)
    o_ref[...] = (x * ss[:, :d] + ss[:, d:]).astype(o_ref.dtype)


def _graphnorm_fused(x, starts, ends, cnt, w, b, ms, hw):
    n, d = x.shape
    nb = cnt.shape[0]
    return pl.pallas_call(
        _graphnorm_fused_kernel,
        out_shape=jax.ShapeDtypeStruct((n, d), x.dtype),
        grid=(1,),
        in_specs=[
            pl.BlockSpec((n, d), lambda i: (0, 0)),
            pl.BlockSpec((nb, 1), lambda i: (0, 0)),
            pl.BlockSpec((nb, 1), lambda i: (0, 0)),
            pl.BlockSpec((1, nb), lambda i: (0, 0)),
            pl.BlockSpec((1, nb), lambda i: (0, 0)),
            pl.BlockSpec((nb, 1), lambda i: (0, 0)),
            pl.BlockSpec((1, d), lambda i: (0, 0)),
            pl.BlockSpec((1, d), lambda i: (0, 0)),
            pl.BlockSpec((1, d), lambda i: (0, 0)),
        ],
        out_specs=pl.BlockSpec((n, d), lambda i: (0, 0)),
        compiler_params=pltpu.CompilerParams(
            dimension_semantics=("arbitrary",),
            vmem_limit_bytes=hw["vmem_limit"]),
    )(x, starts.reshape(nb, 1), ends.reshape(nb, 1),
      starts.reshape(1, nb), ends.reshape(1, nb), cnt, w, b, ms)


def _graphnorm_two_pass(x, starts, ends, cnt, w, b, ms, hw, tile_budget):
    n, d = x.shape
    nb = cnt.shape[0]
    mm_dtype = jnp.bfloat16 if x.dtype == jnp.bfloat16 else jnp.float32

    tm = _row_tile(n, d, x.dtype.itemsize, tile_budget)
    n_tiles = pl.cdiv(n, tm)
    ns = 2 if n_tiles >= 2 else 1              # 2-way split of the reduction
    tps = -(-n_tiles // ns)

    partials = pl.pallas_call(
        functools.partial(_graphnorm_stats_kernel, n_rows=n,
                          tiles_per_split=tps, mm_dtype=mm_dtype),
        out_shape=jax.ShapeDtypeStruct((ns, nb, 2 * d), jnp.float32),
        grid=(ns, tps),
        in_specs=[
            # clamp the tail: clamped duplicate tiles contribute zero (masked)
            pl.BlockSpec((tm, d),
                         lambda c, i: (jnp.minimum(c * tps + i, n_tiles - 1), 0)),
            pl.BlockSpec((nb, 1), lambda c, i: (0, 0)),
            pl.BlockSpec((nb, 1), lambda c, i: (0, 0)),
        ],
        out_specs=pl.BlockSpec((None, nb, 2 * d), lambda c, i: (c, 0, 0)),
        compiler_params=pltpu.CompilerParams(
            dimension_semantics=("parallel", "arbitrary"),
            vmem_limit_bytes=hw["vmem_limit"]),
    )(x, starts.reshape(nb, 1), ends.reshape(nb, 1))

    # --- grid-invariant per-graph math, computed exactly once (hoisted) ----
    total = jnp.sum(partials, axis=0)                  # (B, 2D)
    sums, sumsq = total[:, :d], total[:, d:]
    mean = sums / cnt
    mu = mean * ms
    # E[x^2]-style variance (f32 accumulation). The fused path above uses the
    # exactly-centered formulation whenever x fits VMEM.
    var = jnp.maximum(sumsq / cnt - (2.0 * mean - mu) * mu, 0.0)
    scale = w * lax.rsqrt(var + 1e-6)
    shift = b - mu * scale
    ss = jnp.concatenate([scale, shift], axis=-1)      # (B, 2D)

    return pl.pallas_call(
        functools.partial(_graphnorm_apply_kernel, mm_dtype=mm_dtype),
        out_shape=jax.ShapeDtypeStruct((n, d), x.dtype),
        grid=(n_tiles,),
        in_specs=[
            pl.BlockSpec((tm, d), lambda i: (i, 0)),
            pl.BlockSpec((nb, 2 * d), lambda i: (0, 0)),
            pl.BlockSpec((1, nb), lambda i: (0, 0)),
            pl.BlockSpec((1, nb), lambda i: (0, 0)),
        ],
        out_specs=pl.BlockSpec((tm, d), lambda i: (i, 0)),
        compiler_params=pltpu.CompilerParams(
            dimension_semantics=("parallel",),
            vmem_limit_bytes=hw["vmem_limit"]),
    )(x, ss, starts.reshape(1, nb), ends.reshape(1, nb))


def graphnorm(x, counts, weight, bias, mean_scale, *,
              force_two_pass=False, tile_budget=None):
    """x: (N, D); counts: (B,) int32 nodes-per-graph (contiguous segments)."""
    n, d = x.shape
    nb = counts.shape[0]
    counts = counts.astype(jnp.int32)
    ends = jnp.cumsum(counts)
    starts = ends - counts
    cnt = jnp.maximum(counts.astype(jnp.float32), 1.0).reshape(nb, 1)
    w = weight.reshape(1, d).astype(jnp.float32)
    b = bias.reshape(1, d).astype(jnp.float32)
    ms = mean_scale.reshape(1, d).astype(jnp.float32)
    hw = _hw_params()
    tile_budget = hw["tile_budget"] if tile_budget is None else tile_budget

    # Rough fused-path VMEM need: ~5 f32 copies of x + two one-hots + params.
    fused_bytes = 5 * n * d * 4 + 2 * nb * n * 4 + 8 * nb * d * 4
    if (not force_two_pass) and fused_bytes <= hw["fuse_limit"]:
        return _graphnorm_fused(x, starts, ends, cnt, w, b, ms, hw)
    return _graphnorm_two_pass(x, starts, ends, cnt, w, b, ms, hw, tile_budget)


# ----------------------------------------------------------------------------
# layernorm (nn.LayerNorm(hidden_dim), eps=1e-5, elementwise affine)
# ----------------------------------------------------------------------------
def _layernorm_kernel(x_ref, g_ref, b_ref, o_ref):
    x = x_ref[...].astype(jnp.float32)                       # (TM, D)
    mean = jnp.mean(x, axis=-1, keepdims=True)
    cen = x - mean
    var = jnp.mean(cen * cen, axis=-1, keepdims=True)        # biased
    y = cen * lax.rsqrt(var + 1e-5)
    o_ref[...] = (y * g_ref[...] + b_ref[...]).astype(o_ref.dtype)


def layernorm(x, gamma, beta, *, tile_budget=None):
    n, d = x.shape
    hw = _hw_params()
    tile_budget = hw["tile_budget"] if tile_budget is None else tile_budget
    tm = _row_tile(n, d, x.dtype.itemsize, tile_budget)
    return pl.pallas_call(
        _layernorm_kernel,
        out_shape=jax.ShapeDtypeStruct((n, d), x.dtype),
        grid=(pl.cdiv(n, tm),),
        in_specs=[pl.BlockSpec((tm, d), lambda i: (i, 0)),
                  pl.BlockSpec((1, d), lambda i: (0, 0)),
                  pl.BlockSpec((1, d), lambda i: (0, 0))],
        out_specs=pl.BlockSpec((tm, d), lambda i: (i, 0)),
        compiler_params=pltpu.CompilerParams(
            dimension_semantics=("parallel",),
            vmem_limit_bytes=hw["vmem_limit"]),
    )(x, gamma.reshape(1, d).astype(jnp.float32),
      beta.reshape(1, d).astype(jnp.float32))


# ----------------------------------------------------------------------------
# batchnorm (nn.BatchNorm1d(hidden_dim), training-mode batch stats,
# biased variance, eps=1e-5)
# ----------------------------------------------------------------------------
def _batchnorm_fused_kernel(x_ref, g_ref, b_ref, o_ref):
    """x fully resident in VMEM: centered two-pass variance, one read+write."""
    x = x_ref[...].astype(jnp.float32)
    inv_n = 1.0 / x.shape[0]
    mean = jnp.sum(x, axis=0, keepdims=True) * inv_n
    cen = x - mean
    var = jnp.sum(cen * cen, axis=0, keepdims=True) * inv_n
    scale = g_ref[...] * lax.rsqrt(var + 1e-5)
    o_ref[...] = (cen * scale + b_ref[...]).astype(o_ref.dtype)
    # TODO(synk): running_mean / running_var buffer updates (module state side
    # effect) are not representable in the returned value.


def _batchnorm_stats_kernel(x_ref, out_ref, acc_ref, *, n_rows, tiles_per_split):
    c = pl.program_id(0)
    i = pl.program_id(1)
    tm, d = x_ref.shape
    row0 = (c * tiles_per_split + i) * tm

    x = x_ref[...].astype(jnp.float32)
    rowc = lax.broadcasted_iota(jnp.int32, (tm, 1), 0) + row0
    x = jnp.where(rowc < n_rows, x, 0.0)
    xx = jnp.concatenate([x, x * x], axis=-1)                 # (TM, 2D)

    @pl.when(i == 0)
    def _():
        acc_ref[...] = jnp.zeros_like(acc_ref)

    # pure vreg adds into an (8, 2D) accumulator; no per-tile sublane shuffle
    acc_ref[...] += jnp.sum(xx.reshape(tm // 8, 8, 2 * d), axis=0)

    @pl.when(i == tiles_per_split - 1)
    def _():
        out_ref[...] = jnp.sum(acc_ref[...], axis=0, keepdims=True)


def _scale_shift_apply_kernel(x_ref, scale_ref, shift_ref, o_ref):
    x = x_ref[...].astype(jnp.float32)
    o_ref[...] = (x * scale_ref[...] + shift_ref[...]).astype(o_ref.dtype)


def batchnorm(x, gamma, beta, *, force_two_pass=False, tile_budget=None):
    n, d = x.shape
    hw = _hw_params()
    tile_budget = hw["tile_budget"] if tile_budget is None else tile_budget
    g = gamma.reshape(1, d).astype(jnp.float32)
    b = beta.reshape(1, d).astype(jnp.float32)

    fused_bytes = 4 * n * d * 4
    if (not force_two_pass) and fused_bytes <= hw["fuse_limit"]:
        return pl.pallas_call(
            _batchnorm_fused_kernel,
            out_shape=jax.ShapeDtypeStruct((n, d), x.dtype),
            grid=(1,),
            in_specs=[pl.BlockSpec((n, d), lambda i: (0, 0)),
                      pl.BlockSpec((1, d), lambda i: (0, 0)),
                      pl.BlockSpec((1, d), lambda i: (0, 0))],
            out_specs=pl.BlockSpec((n, d), lambda i: (0, 0)),
            compiler_params=pltpu.CompilerParams(
                dimension_semantics=("arbitrary",),
                vmem_limit_bytes=hw["vmem_limit"]),
        )(x, g, b)

    # --- streaming two-pass -------------------------------------------------
    tm = _row_tile(n, d, x.dtype.itemsize, tile_budget)
    n_tiles = pl.cdiv(n, tm)
    ns = 2 if n_tiles >= 2 else 1
    tps = -(-n_tiles // ns)

    partials = pl.pallas_call(
        functools.partial(_batchnorm_stats_kernel, n_rows=n, tiles_per_split=tps),
        out_shape=jax.ShapeDtypeStruct((ns, 1, 2 * d), jnp.float32),
        grid=(ns, tps),
        in_specs=[pl.BlockSpec(
            (tm, d), lambda c, i: (jnp.minimum(c * tps + i, n_tiles - 1), 0))],
        out_specs=pl.BlockSpec((None, 1, 2 * d), lambda c, i: (c, 0, 0)),
        scratch_shapes=[pltpu.VMEM((8, 2 * d), jnp.float32)],
        compiler_params=pltpu.CompilerParams(
            dimension_semantics=("parallel", "arbitrary"),
            vmem_limit_bytes=hw["vmem_limit"]),
    )(x)

    # grid-invariant math done once here (hoisted out of the apply pass)
    total = jnp.sum(partials, axis=0)                  # (1, 2D)
    mean = total[:, :d] / n
    var = jnp.maximum(total[:, d:] / n - mean * mean, 0.0)
    scale = g * lax.rsqrt(var + 1e-5)
    shift = b - mean * scale
    # TODO(synk): running_mean / running_var buffer updates not representable.

    return pl.pallas_call(
        _scale_shift_apply_kernel,
        out_shape=jax.ShapeDtypeStruct((n, d), x.dtype),
        grid=(n_tiles,),
        in_specs=[pl.BlockSpec((tm, d), lambda i: (i, 0)),
                  pl.BlockSpec((1, d), lambda i: (0, 0)),
                  pl.BlockSpec((1, d), lambda i: (0, 0))],
        out_specs=pl.BlockSpec((tm, d), lambda i: (i, 0)),
        compiler_params=pltpu.CompilerParams(
            dimension_semantics=("parallel",),
            vmem_limit_bytes=hw["vmem_limit"]),
    )(x, scale, shift)


# ----------------------------------------------------------------------------
# NormLayer wrapper (mirrors the PyTorch module's dispatch & init)
# ----------------------------------------------------------------------------
class NormLayer:
    def __init__(self, hidden_dim, norm_type):
        self.norm_type = norm_type
        self.hidden_dim = hidden_dim
        if norm_type in ("batchnorm", "layernorm"):
            self.gamma = jnp.ones((hidden_dim,), jnp.float32)
            self.beta = jnp.zeros((hidden_dim,), jnp.float32)
        elif norm_type == "graphnorm":
            self.weight = jnp.ones((hidden_dim,), jnp.float32)
            self.bias = jnp.zeros((hidden_dim,), jnp.float32)
            self.mean_scale = jnp.ones((hidden_dim,), jnp.float32)
        else:
            raise NotImplementedError

    def __call__(self, batch_num_nodes, x):
        if self.norm_type == "batchnorm":
            return batchnorm(x, self.gamma, self.beta)
        if self.norm_type == "layernorm":
            return layernorm(x, self.gamma, self.beta)
        if isinstance(batch_num_nodes, (list, tuple)):
            # graphnorm assumes rows are contiguous & ordered by graph
            assert sum(int(c) for c in batch_num_nodes) == x.shape[0], \
                "graphnorm: sum(batch_num_nodes) must equal number of rows"
        counts = jnp.asarray(batch_num_nodes, dtype=jnp.int32)
        return graphnorm(x, counts, self.weight, self.bias, self.mean_scale)


# ----------------------------------------------------------------------------
# pure-JAX references (correctness checks)
# ----------------------------------------------------------------------------
def graphnorm_ref(x, counts, weight, bias, mean_scale):
    nb = counts.shape[0]
    seg = jnp.repeat(jnp.arange(nb), counts, total_repeat_length=x.shape[0])
    mean = jax.ops.segment_sum(x, seg, num_segments=nb) / counts[:, None]
    sub = x - mean[seg] * mean_scale
    var = jax.ops.segment_sum(sub ** 2, seg, num_segments=nb) / counts[:, None]
    std = jnp.sqrt(var + 1e-6)
    return weight * sub / std[seg] + bias


if __name__ == "__main__":
    key = jax.random.PRNGKey(0)
    hidden_dim = 32

    # --- small batch: exercises the fused single-pass kernels ---------------
    batch_num_nodes = [3, 5, 4]                  # 3 graphs, 12 nodes total
    n_nodes = sum(batch_num_nodes)
    x = jax.random.normal(key, (n_nodes, hidden_dim), dtype=jnp.float32)
    counts = jnp.asarray(batch_num_nodes, dtype=jnp.int32)

    gn = NormLayer(hidden_dim, "graphnorm")
    out_gn = jax.block_until_ready(gn(batch_num_nodes, x))
    ref_gn = graphnorm_ref(x, counts, gn.weight, gn.bias, gn.mean_scale)
    assert out_gn.shape == x.shape
    assert jnp.allclose(out_gn, ref_gn, atol=1e-4, rtol=1e-4), "graphnorm (fused) mismatch"

    ln = NormLayer(hidden_dim, "layernorm")
    out_ln = jax.block_until_ready(ln(batch_num_nodes, x))
    mean = x.mean(-1, keepdims=True)
    var = ((x - mean) ** 2).mean(-1, keepdims=True)
    ref_ln = (x - mean) / jnp.sqrt(var + 1e-5)
    assert jnp.allclose(out_ln, ref_ln, atol=1e-5, rtol=1e-5), "layernorm mismatch"

    bn = NormLayer(hidden_dim, "batchnorm")
    out_bn = jax.block_until_ready(bn(batch_num_nodes, x))
    m0 = x.mean(0, keepdims=True)
    v0 = ((x - m0) ** 2).mean(0, keepdims=True)
    ref_bn = (x - m0) / jnp.sqrt(v0 + 1e-5)
    assert jnp.allclose(out_bn, ref_bn, atol=1e-4, rtol=1e-4), "batchnorm (fused) mismatch"

    # --- larger batch, forced streaming two-pass path (multi-tile grid,
    #     2-way split stats reduction, clamped tail tile) --------------------
    counts2_list = [64, 70, 66]                  # 200 nodes -> 7 tiles of 32
    n2 = sum(counts2_list)
    x2 = jax.random.normal(jax.random.PRNGKey(1), (n2, hidden_dim), jnp.float32)
    counts2 = jnp.asarray(counts2_list, jnp.int32)

    out_gn2 = jax.block_until_ready(
        graphnorm(x2, counts2, gn.weight, gn.bias, gn.mean_scale,
                  force_two_pass=True, tile_budget=4096))
    ref_gn2 = graphnorm_ref(x2, counts2, gn.weight, gn.bias, gn.mean_scale)
    assert jnp.allclose(out_gn2, ref_gn2, atol=1e-4, rtol=1e-4), \
        "graphnorm (two-pass) mismatch"

    out_bn2 = jax.block_until_ready(
        batchnorm(x2, bn.gamma, bn.beta, force_two_pass=True, tile_budget=4096))
    m2 = x2.mean(0, keepdims=True)
    v2 = ((x2 - m2) ** 2).mean(0, keepdims=True)
    ref_bn2 = (x2 - m2) / jnp.sqrt(v2 + 1e-5)
    assert jnp.allclose(out_bn2, ref_bn2, atol=1e-4, rtol=1e-4), \
        "batchnorm (two-pass) mismatch"

    print("KERNEL_OK")
</pallas_src>

<mosaic_0001>
module attributes {stable_mosaic.version = 11 : i64} {
  func.func @_graphnorm_fused_kernel(%arg0: i32, %arg1: memref<12x32xf32, #tpu.memory_space<vmem>>, %arg2: memref<3x1xi32, #tpu.memory_space<vmem>>, %arg3: memref<3x1xi32, #tpu.memory_space<vmem>>, %arg4: memref<1x3xi32, #tpu.memory_space<vmem>>, %arg5: memref<1x3xi32, #tpu.memory_space<vmem>>, %arg6: memref<3x1xf32, #tpu.memory_space<vmem>>, %arg7: memref<1x32xf32, #tpu.memory_space<vmem>>, %arg8: memref<1x32xf32, #tpu.memory_space<vmem>>, %arg9: memref<1x32xf32, #tpu.memory_space<vmem>>, %arg10: memref<12x32xf32, #tpu.memory_space<vmem>>) attributes {dimension_semantics = [#tpu.dimension_semantics<arbitrary>], iteration_bounds = array<i64: 1>, scalar_prefetch = 0 : i64, scratch_operands = 0 : i64, tpu.core_type = #tpu.core_type<tc>, window_params = [{pipeline_mode = #tpu.pipeline_mode<synchronous>, transform_indices = @transform_0, window_bounds = array<i64: 12, 32>}, {pipeline_mode = #tpu.pipeline_mode<synchronous>, transform_indices = @transform_1, window_bounds = array<i64: 3, 1>}, {pipeline_mode = #tpu.pipeline_mode<synchronous>, transform_indices = @transform_2, window_bounds = array<i64: 3, 1>}, {pipeline_mode = #tpu.pipeline_mode<synchronous>, transform_indices = @transform_3, window_bounds = array<i64: 1, 3>}, {pipeline_mode = #tpu.pipeline_mode<synchronous>, transform_indices = @transform_4, window_bounds = array<i64: 1, 3>}, {pipeline_mode = #tpu.pipeline_mode<synchronous>, transform_indices = @transform_5, window_bounds = array<i64: 3, 1>}, {pipeline_mode = #tpu.pipeline_mode<synchronous>, transform_indices = @transform_6, window_bounds = array<i64: 1, 32>}, {pipeline_mode = #tpu.pipeline_mode<synchronous>, transform_indices = @transform_7, window_bounds = array<i64: 1, 32>}, {pipeline_mode = #tpu.pipeline_mode<synchronous>, transform_indices = @transform_8, window_bounds = array<i64: 1, 32>}, {pipeline_mode = #tpu.pipeline_mode<synchronous>, transform_indices = @transform_9, window_bounds = array<i64: 12, 32>}]} {
    %c0 = arith.constant 0 : index
    %c0_0 = arith.constant 0 : index
    %0 = vector.load %arg1[%c0, %c0_0] : memref<12x32xf32, #tpu.memory_space<vmem>>, vector<12x32xf32>
    %1 = tpu.iota {dimensions = array<i32: 1>} : vector<3x12xi32>
    %c0_1 = arith.constant 0 : index
    %c0_2 = arith.constant 0 : index
    %2 = vector.load %arg2[%c0_1, %c0_2] : memref<3x1xi32, #tpu.memory_space<vmem>>, vector<3x1xi32>
    %3 = vector.broadcast %2 : vector<3x1xi32> to vector<3x12xi32>
    %4 = arith.cmpi sge, %1, %3 : vector<3x12xi32>
    %c0_3 = arith.constant 0 : index
    %c0_4 = arith.constant 0 : index
    %5 = vector.load %arg3[%c0_3, %c0_4] : memref<3x1xi32, #tpu.memory_space<vmem>>, vector<3x1xi32>
    %6 = vector.broadcast %5 : vector<3x1xi32> to vector<3x12xi32>
    %7 = arith.cmpi slt, %1, %6 : vector<3x12xi32>
    %8 = arith.andi %4, %7 : vector<3x12xi1>
    %9 = arith.extui %8 : vector<3x12xi1> to vector<3x12xi32>
    %10 = arith.sitofp %9 : vector<3x12xi32> to vector<3x12xf32>
    %11 = tpu.iota {dimensions = array<i32: 0>} : vector<12x3xi32>
    %c0_5 = arith.constant 0 : index
    %c0_6 = arith.constant 0 : index
    %12 = vector.load %arg4[%c0_5, %c0_6] : memref<1x3xi32, #tpu.memory_space<vmem>>, vector<1x3xi32>
    %13 = vector.broadcast %12 : vector<1x3xi32> to vector<12x3xi32>
    %14 = arith.cmpi sge, %11, %13 : vector<12x3xi32>
    %c0_7 = arith.constant 0 : index
    %c0_8 = arith.constant 0 : index
    %15 = vector.load %arg5[%c0_7, %c0_8] : memref<1x3xi32, #tpu.memory_space<vmem>>, vector<1x3xi32>
    %16 = vector.broadcast %15 : vector<1x3xi32> to vector<12x3xi32>
    %17 = arith.cmpi slt, %11, %16 : vector<12x3xi32>
    %18 = arith.andi %14, %17 : vector<12x3xi1>
    %19 = arith.extui %18 : vector<12x3xi1> to vector<12x3xi32>
    %20 = arith.sitofp %19 : vector<12x3xi32> to vector<12x3xf32>
    %c0_9 = arith.constant 0 : index
    %c0_10 = arith.constant 0 : index
    %21 = vector.load %arg6[%c0_9, %c0_10] : memref<3x1xf32, #tpu.memory_space<vmem>>, vector<3x1xf32>
    %cst = arith.constant 1.000000e+00 : f32
    %22 = vector.broadcast %cst : f32 to vector<3x1xf32>
    %23 = arith.divf %22, %21 : vector<3x1xf32>
    %cst_11 = arith.constant dense<0.000000e+00> : vector<3x32xf32>
    %24 = tpu.matmul %10, %0, %cst_11 {dimension_numbers = #tpu.dot_dimension_numbers<[1], [0], [0], [1], [0, 0, 1, 1], [], []>} : vector<3x12xf32>, vector<12x32xf32>, vector<3x32xf32> -> vector<3x32xf32>
    %25 = vector.broadcast %23 : vector<3x1xf32> to vector<3x32xf32>
    %26 = arith.mulf %24, %25 : vector<3x32xf32>
    %c0_12 = arith.constant 0 : index
    %c0_13 = arith.constant 0 : index
    %27 = vector.load %arg9[%c0_12, %c0_13] : memref<1x32xf32, #tpu.memory_space<vmem>>, vector<1x32xf32>
    %28 = vector.broadcast %27 : vector<1x32xf32> to vector<3x32xf32>
    %29 = arith.mulf %26, %28 : vector<3x32xf32>
    %cst_14 = arith.constant dense<0.000000e+00> : vector<12x32xf32>
    %30 = tpu.matmul %20, %29, %cst_14 {dimension_numbers = #tpu.dot_dimension_numbers<[1], [0], [0], [1], [0, 0, 1, 1], [], []>} : vector<12x3xf32>, vector<3x32xf32>, vector<12x32xf32> -> vector<12x32xf32>
    %31 = arith.subf %0, %30 : vector<12x32xf32>
    %32 = arith.mulf %31, %31 : vector<12x32xf32>
    %cst_15 = arith.constant dense<0.000000e+00> : vector<3x32xf32>
    %33 = tpu.matmul %10, %32, %cst_15 {dimension_numbers = #tpu.dot_dimension_numbers<[1], [0], [0], [1], [0, 0, 1, 1], [], []>} : vector<3x12xf32>, vector<12x32xf32>, vector<3x32xf32> -> vector<3x32xf32>
    %34 = vector.broadcast %23 : vector<3x1xf32> to vector<3x32xf32>
    %35 = arith.mulf %33, %34 : vector<3x32xf32>
    %c0_16 = arith.constant 0 : index
    %c0_17 = arith.constant 0 : index
    %36 = vector.load %arg7[%c0_16, %c0_17] : memref<1x32xf32, #tpu.memory_space<vmem>>, vector<1x32xf32>
    %cst_18 = arith.constant 9.99999997E-7 : f32
    %37 = vector.broadcast %cst_18 : f32 to vector<3x32xf32>
    %38 = arith.addf %35, %37 : vector<3x32xf32>
    %39 = math.rsqrt %38 : vector<3x32xf32>
    %40 = vector.broadcast %36 : vector<1x32xf32> to vector<3x32xf32>
    %41 = arith.mulf %40, %39 : vector<3x32xf32>
    %cst_19 = arith.constant dense<0.000000e+00> : vector<12x32xf32>
    %42 = tpu.matmul %20, %41, %cst_19 {dimension_numbers = #tpu.dot_dimension_numbers<[1], [0], [0], [1], [0, 0, 1, 1], [], []>} : vector<12x3xf32>, vector<3x32xf32>, vector<12x32xf32> -> vector<12x32xf32>
    %43 = arith.mulf %31, %42 : vector<12x32xf32>
    %c0_20 = arith.constant 0 : index
    %c0_21 = arith.constant 0 : index
    %44 = vector.load %arg8[%c0_20, %c0_21] : memref<1x32xf32, #tpu.memory_space<vmem>>, vector<1x32xf32>
    %45 = vector.broadcast %44 : vector<1x32xf32> to vector<12x32xf32>
    %46 = arith.addf %43, %45 : vector<12x32xf32>
    %c0_22 = arith.constant 0 : index
    %c0_23 = arith.constant 0 : index
    %47 = vector.load %arg10[%c0_22, %c0_23] : memref<12x32xf32, #tpu.memory_space<vmem>>, vector<12x32xf32>
    tpu.vector_store %arg10[%c0_22, %c0_23], %46 {strides = array<i32>} : memref<12x32xf32, #tpu.memory_space<vmem>>, vector<12x32xf32>,
    return
  }
  func.func @transform_0(%arg0: i32) -> (i32, i32) {
    %c0_i32 = arith.constant 0 : i32
    %c0_i32_0 = arith.constant 0 : i32
    %c0_i32_1 = arith.constant 0 : i32
    return %c0_i32, %c0_i32_0 : i32, i32
  }
  func.func @transform_1(%arg0: i32) -> (i32, i32) {
    %c0_i32 = arith.constant 0 : i32
    %c0_i32_0 = arith.constant 0 : i32
    %c0_i32_1 = arith.constant 0 : i32
    return %c0_i32, %c0_i32_0 : i32, i32
  }
  func.func @transform_2(%arg0: i32) -> (i32, i32) {
    %c0_i32 = arith.constant 0 : i32
    %c0_i32_0 = arith.constant 0 : i32
    %c0_i32_1 = arith.constant 0 : i32
    return %c0_i32, %c0_i32_0 : i32, i32
  }
  func.func @transform_3(%arg0: i32) -> (i32, i32) {
    %c0_i32 = arith.constant 0 : i32
    %c0_i32_0 = arith.constant 0 : i32
    %c0_i32_1 = arith.constant 0 : i32
    return %c0_i32, %c0_i32_0 : i32, i32
  }
  func.func @transform_4(%arg0: i32) -> (i32, i32) {
    %c0_i32 = arith.constant 0 : i32
    %c0_i32_0 = arith.constant 0 : i32
    %c0_i32_1 = arith.constant 0 : i32
    return %c0_i32, %c0_i32_0 : i32, i32
  }
  func.func @transform_5(%arg0: i32) -> (i32, i32) {
    %c0_i32 = arith.constant 0 : i32
    %c0_i32_0 = arith.constant 0 : i32
    %c0_i32_1 = arith.constant 0 : i32
    return %c0_i32, %c0_i32_0 : i32, i32
  }
  func.func @transform_6(%arg0: i32) -> (i32, i32) {
    %c0_i32 = arith.constant 0 : i32
    %c0_i32_0 = arith.constant 0 : i32
    %c0_i32_1 = arith.constant 0 : i32
    return %c0_i32, %c0_i32_0 : i32, i32
  }
  func.func @transform_7(%arg0: i32) -> (i32, i32) {
    %c0_i32 = arith.constant 0 : i32
    %c0_i32_0 = arith.constant 0 : i32
    %c0_i32_1 = arith.constant 0 : i32
    return %c0_i32, %c0_i32_0 : i32, i32
  }
  func.func @transform_8(%arg0: i32) -> (i32, i32) {
    %c0_i32 = arith.constant 0 : i32
    %c0_i32_0 = arith.constant 0 : i32
    %c0_i32_1 = arith.constant 0 : i32
    return %c0_i32, %c0_i32_0 : i32, i32
  }
  func.func @transform_9(%arg0: i32) -> (i32, i32) {
    %c0_i32 = arith.constant 0 : i32
    %c0_i32_0 = arith.constant 0 : i32
    %c0_i32_1 = arith.constant 0 : i32
    return %c0_i32, %c0_i32_0 : i32, i32
  }
}

</mosaic_0001>

<bundles_post_ra>
// kernel: tpu_custom_call.1
= control target key start
LH: loop header
LB: loop body
LE: loop exit
PB: predicated region body
PF: predicated region fallthrough
CT: control target
= control target key end

     0   :  { %14 = vsyncpa [#allocation3], 0  ;;  %s684_s0 = inlined_call_operand.hbm [shape: f32[12,32], index: 0, kind: input, shape index: {}]   ;;  %s685_s1 = inlined_call_operand.vmem [shape: s32[3,1], index: 1, kind: input, shape index: {}]   ;;  %s686_s2 = inlined_call_operand.vmem [shape: s32[3,1], index: 2, kind: input, shape index: {}]   ;;  %s687_s3 = inlined_call_operand.vmem [shape: s32[1,3], index: 3, kind: input, shape index: {}]   ;;  %s688_s4 = inlined_call_operand.vmem [shape: s32[1,3], index: 4, kind: input, shape index: {}]   ;;  %s689_s5 = inlined_call_operand.vmem [shape: f32[3,1], index: 5, kind: input, shape index: {}]   ;;  %s690_s6 = inlined_call_operand.vmem [shape: f32[1,32], index: 6, kind: input, shape index: {}]   ;;  %s691_s7 = inlined_call_operand.vmem [shape: f32[1,32], index: 7, kind: input, shape index: {}]   ;;  %s692_s8 = inlined_call_operand.vmem [shape: f32[1,32], index: 8, kind: input, shape index: {}]   ;;  %s693_s9 = inlined_call_operand.hbm [shape: f32[12,32], index: 9, kind: output, shape index: {}]  }
   0x1   :  { %15 = vsyncpa [#allocation4], 0  ;;  %s577_s30 = smov [#allocation2]  }
   0x2   :  { %s21_s10 = sshll.u32 %s577_s30, 4  ;;  %s22_s10 = int_to_ptr.vmem [resolvable:$true] %s21_s10 }
   0x3   :  { %s541_s11 = scalar_lea.vmem %s22_s10, 256  ;;  %p546_p1 = scmp.lt.s32.totalorder %s22_s10, %s22_s10 }
   0x4   :  { %p542_p0 = scmp.ne.s32.totalorder %s22_s10, %s541_s11  ;;  %p547_p2 = scmp.lt.s32.totalorder %s541_s11, %s541_s11 }
   0x6   :  { %p548_p3 = por %p547_p2, %p546_p1 }
   0x8   :  { %p549_p4 = pnand %p548_p3, %p542_p0 }
   0xa   :  { %552 = shalt.err (!%p549_p4)
}
   0xb   :  { %s578_s12 = smov 128   ;;  %s579_s13 = smov 8  }
   0xc   :  { %27 = dma.hbm_to_vmem [thread:$0]  %s684_s0, 256, %s22_s10, [#allocation3], %s578_s12, %s578_s12, %s579_s13  }
   0xd   :  { %573 = dma.done.wait [#allocation3], 256  }
   0xe   :  { %574 = vsyncadd [#allocation3], 4294967040  ;;  %v580_v0 = vmov 0   ;;  %v581_v1 = vmov 0.0   ;;  %v51_v2 = vld [vmem:[%s685_s1] sm:$0x7]  ;;  %v49_v8 = vlaneseq }
   0xf   :  { %527 = vset.pattern.permute.xlu0 %v580_v0  ;;  %528 = vset.pattern.permute.xlu1 %v580_v0  ;;  %v48_v3 = vld [vmem:[#allocation2 + $0x8] sm:$0xf]  ;;  %vm94_vm0 = vcmask 1043456   ;;  %v56_v4 = vld [vmem:[%s686_s2] sm:$0x7]  ;;  %vm582_vm1 = vmmov 0  }
  0x10   :  { %496 = vmatprep.subr.mxu0 %v581_v1  ;;  %53 = vperm.xlu0 %527, %v51_v2   ;;  %v47_v5 = vld [vmem:[#allocation2] sm:$0xff]  ;;  %v50_v10 = vand.u32 127, %v49_v8  ;;  %vm90_vm4 = vcmask 97280   ;;  %v65_v13 = vshrl.u32 %v49_v8, 7  ;;  %vm182_vm11 = vcmask 23552   ;;  %s583_s25 = smov [#allocation5]  }
  0x11   :  { %497 = vmatpush3.msk.msra.mxu0 %vm94_vm0, %v48_v3  ;;  %500 = vmatprep.mubr.msk.f32.mxu0 %vm582_vm1, %v581_v1  ;;  %v87_v6 = vld [vmem:[%s689_s5] sm:$0x7]  ;;  %vm189_vm13 = vcmask 1042432   ;;  %vm447_vm14 = vcmask 257024   ;;  %s454_s26 = sshll.u32 %s583_s25, 4  ;;  %vm445_vm15 = vcmask 261120   ;;  %s455_s26 = int_to_ptr.vmem [resolvable:$true] %s454_s26 }
  0x12   :  { %498 = vmatprep.subr.mxu0 %v581_v1  ;;  %529 = vrcp.f32 %v87_v6  ;;  %v66_v14 = vadd.s32 8, %v65_v13  ;;  %v467_v15 = vld [vmem:[%s687_s3] ss:$0 sm:$0xff]  ;;  %p558_p6 = scmp.lt.s32.totalorder %s455_s26, %s455_s26 }
  0x13   :  { %499 = vmatpush3.msra.mxu0 %v47_v5  ;;  %vm72_vm6 = vcmp.ge.s32.totalorder %v65_v13, %v467_v15  ;;  %v468_v16 = vld [vmem:[%s688_s4] ss:$0 sm:$0xff] }
  0x14   :  { %58 = vperm.xlu0 %527, %v56_v4   ;;  %vm73_vm7 = vcmp.ge.s32.totalorder %v66_v14, %v467_v15  ;;  %vm79_vm8 = vcmp.lt.s32.totalorder %v65_v13, %v468_v16  ;;  %vm80_vm9 = vcmp.lt.s32.totalorder %v66_v14, %v468_v16  ;;  %v473_v20 = vld [vmem:[%s692_s8] ss:$0 sm:$0xff] }
  0x15   :  { %vm81_vm10 = vmand %vm72_vm6, %vm79_vm8  ;;  %v479_v35 = vld [vmem:[%s690_s6] ss:$0 sm:$0xff]  ;;  %s553_s6 = scalar_lea.vmem %s455_s26, 256 }
  0x16   :  { %v469_v17 = vsel %vm81_vm10, 1.0, %v581_v1  ;;  %vm82_vm12 = vmand %vm73_vm7, %vm80_vm9  ;;  %v483_v39 = vld [vmem:[%s691_s7] ss:$0 sm:$0xff]  ;;  %p554_p5 = scmp.ne.s32.totalorder %s455_s26, %s553_s6  ;;  %p559_p7 = scmp.lt.s32.totalorder %s553_s6, %s553_s6 }
  0x17   :  { %505 = vmatprep.mubr.msk.f32.mxu1 %vm182_vm11, %v469_v17  ;;  %v470_v24 = vsel %vm82_vm12, 1.0, %v581_v1 }
  0x18   :  { %p560_p8 = por %p559_p7, %p558_p6 }
  0x1a   :  { %p561_p9 = pnand %p560_p8, %p554_p5 }
  0x1f   :  { %v530_v7 = vpop.eup %529 }
  0x20   :  { %170 = vperm.xlu1 %528, %v530_v7  }
  0x8b   :  { %v54_v9 = vpop.permute.xlu0 %53 }
  0x8c   :  { %vm55_vm2 = vcmp.ge.s32.totalorder %v50_v10, %v54_v9 }
  0x8f   :  { %v59_v11 = vpop.permute.xlu0 %58 }
  0x90   :  { %vm60_vm3 = vcmp.lt.s32.totalorder %v50_v10, %v59_v11 }
  0x91   :  { %vm61_vm5 = vmand %vm55_vm2, %vm60_vm3 }
  0x92   :  { %v466_v12 = vsel %vm61_vm5, 1.0, %v581_v1 }
  0x93   :  { %501 = vmatmul.mubr.msk.f32.vlgmr.msra.gmra.mxu0 %vm90_vm4, %v466_v12 }
  0x94   :  { %517 = vmatprep.mubr.msk.f32.mxu0 %vm182_vm11, %v469_v17 }
  0x9b   :  { %v171_v18 = vpop.permute.xlu1 %170 }
 0x153   :  { %v164_v19 = vpop.f32.mrf.mxu0 }
 0x154   :  { %v173_v21 = vmul.f32 %v171_v18, %v164_v19 }
 0x155   :  { %v502_v22 = vpop.f32.mrf.mxu0 }
 0x156   :  { %v181_v23 = vmul.f32 %v473_v20, %v173_v21 }
 0x158   :  { %503 = vmatprep.subr.msk.mxu1 %vm189_vm13, %v181_v23 }
 0x159   :  { %504 = vmatpush3.msk.msra.mxu1 %vm189_vm13, %v181_v23 }
 0x15a   :  { %506 = vmatmul.mubr.msk.f32.vlgmr.msra.gmra.mxu1 %vm182_vm11, %v470_v24  ;;  %508 = vmatprep.subr.mxu1 %v581_v1 }
 0x15b   :  { %512 = vmatprep.mubr.msk.f32.mxu1 %vm582_vm1, %v581_v1 }
 0x21a   :  { %v507_v25 = vpop.f32.mrf.mxu1 }
 0x21b   :  { %v269_v26 = vsub.f32 %v48_v3, %v507_v25 }
 0x21c   :  { %v259_v27 = vpop.f32.mrf.mxu1 }
 0x21d   :  { %v271_v28 = vmul.f32 %v269_v26, %v269_v26  ;;  %v268_v29 = vsub.f32 %v47_v5, %v259_v27 }
 0x21f   :  { %v270_v30 = vmul.f32 %v268_v29, %v268_v29  ;;  %509 = vmatpush3.msk.msra.mxu1 %vm94_vm0, %v271_v28 }
 0x220   :  { %510 = vmatprep.subr.mxu1 %v581_v1 }
 0x221   :  { %511 = vmatpush3.msra.mxu1 %v270_v30 }
 0x222   :  { %513 = vmatmul.mubr.msk.f32.vlgmr.msra.gmra.mxu1 %vm90_vm4, %v466_v12 }
 0x2e2   :  { %v341_v31 = vpop.f32.mrf.mxu1 }
 0x2e3   :  { %v345_v32 = vmul.f32 %v341_v31, %v171_v18 }
 0x2e4   :  { %v514_v33 = vpop.f32.mrf.mxu1 }
 0x2e5   :  { %v347_v34 = vadd.f32 1e-06, %v345_v32 }
 0x2e7   :  { %531 = vrsqrt.f32 %v347_v34 }
 0x2f4   :  { %v532_v36 = vpop.eup %531 }
 0x2f5   :  { %v355_v37 = vmul.f32 %v532_v36, %v479_v35 }
 0x2f7   :  { %515 = vmatprep.subr.msk.mxu0 %vm189_vm13, %v355_v37 }
 0x2f8   :  { %516 = vmatpush3.msk.msra.mxu0 %vm189_vm13, %v355_v37 }
 0x2f9   :  { %518 = vmatmul.mubr.msk.f32.vlgmr.msra.gmra.mxu0 %vm182_vm11, %v470_v24 }
 0x3b9   :  { %v519_v38 = vpop.f32.mrf.mxu0 }
 0x3ba   :  { %v435_v40 = vmul.f32 %v519_v38, %v269_v26 }
 0x3bb   :  { %v425_v41 = vpop.f32.mrf.mxu0 }
 0x3bc   :  { %v444_v42 = vadd.f32 %v483_v39, %v435_v40  ;;  %v434_v43 = vmul.f32 %v425_v41, %v268_v29 }
 0x3be   :  { %v443_v44 = vadd.f32 %v483_v39, %v434_v43  ;;  %448 = vst.msk [vmem:[#allocation5 + $0x8] sm:$0xf] %vm447_vm14, %v444_v42 }
 0x3c0   :  { %446 = vst.msk [vmem:[#allocation5] sm:$0xff] %vm445_vm15, %v443_v44 }
 0x3c1   :  { %564 = shalt.err (!%p561_p9)
}
 0x3c2   :  { %460 = dma.vmem_to_hbm [thread:$0]  %s455_s26, 256, %s693_s9, [#allocation4], %s578_s12, %s578_s12, %s579_s13  }
 0x3c3   :  { %575 = dma.done.wait [#allocation4], 256  }
 0x3c4   :  { %576 = vsyncadd [#allocation4], 4294967040 }
 0x3c5   :  { %464 = vsyncpa [#allocation3], 1 }
 0x3c6   :  { %465 = vsyncpa [#allocation4], 1 }

</bundles_post_ra>
